<compile_context>
chip_gen: v7x
topology: tpu7x:2x2x1
jax: 0.10.0
libtpu: 0.0.40
codegen_flags: <defaults>
</compile_context>

<pallas_src>
import jax
import jax.numpy as jnp
from jax.experimental import pallas as pl
from jax.experimental.pallas import tpu as pltpu


# ----------------------------- fused kernel --------------------------------

def vae_fused_kernel(x_ref, slab_h_ref, slab_o_ref, eps_ref, dist_ref, out_ref):
    """Fused encoder -> reparameterize -> decoder (samples never leave VMEM).

    Inputs (all VMEM, 4 DMAs total):
      x_ref      [B, D]              data
      slab_h_ref [D+1+Z+1, H]        packed {w1, b1, w3, b3}
      slab_o_ref [2H+2, max(2Z, D)]  packed {wm|wv, bm|bv, w4, b4}
      eps_ref    [B*S, Z]            pre-flattened N(0,1) draws (batch-major)
    Outputs:
      dist_ref   [B, 2Z]             mu | logvar (split on host)
      out_ref    [B*S, D]            decoder logits ([B,S,D] view on host)
    """
    B, D = x_ref.shape
    BS, Z = eps_ref.shape
    S = BS // B
    H = slab_h_ref.shape[1]
    twoZ = 2 * Z

    # ---- carve the packed parameter slabs (static slices) ----
    w1 = slab_h_ref[0:D, :]                       # [D, H]
    b1 = slab_h_ref[D:D + 1, :]                   # [1, H]
    w3 = slab_h_ref[D + 1:D + 1 + Z, :]           # [Z, H]
    b3 = slab_h_ref[D + 1 + Z:D + 2 + Z, :]       # [1, H]
    wmv = slab_o_ref[0:H, 0:twoZ]                 # [H, 2Z]   (mu | logvar proj)
    bmv = slab_o_ref[H:H + 1, 0:twoZ]             # [1, 2Z]
    w4 = slab_o_ref[H + 1:2 * H + 1, 0:D]         # [H, D]
    b4 = slab_o_ref[2 * H + 1:2 * H + 2, 0:D]     # [1, D]

    # ---- encoder ----
    x = x_ref[...]                                                      # [B, D]
    h = jnp.tanh(jnp.dot(x, w1, preferred_element_type=jnp.float32) + b1)  # [B, H]
    mulv = jnp.dot(h, wmv, preferred_element_type=jnp.float32) + bmv       # [B, 2Z]
    dist_ref[...] = mulv                                                # mu | logvar

    mu = mulv[:, :Z]                                                    # [B, Z]
    std = jnp.exp(0.5 * mulv[:, Z:])                                    # [B, Z]

    # ---- reparameterization: per-batch-row VPU broadcast (no rep-matmul) ----
    # eps is flattened batch-major ([b*S + s, :] = eps[b, s, :]); keep the
    # wrapper's eps.reshape(B*S, Z) in sync with this layout.
    eps = eps_ref[...]                                                  # [BS, Z]
    z_rows = []
    for b in range(B):  # B is a trace-time constant -> tiny unroll
        z_rows.append(mu[b:b + 1, :] + std[b:b + 1, :] * eps[b * S:(b + 1) * S, :])
    z = jnp.concatenate(z_rows, axis=0)                                 # [BS, Z]

    # ---- decoder ----
    h2 = jnp.tanh(jnp.dot(z, w3, preferred_element_type=jnp.float32) + b3)  # [BS, H]
    out_ref[...] = jnp.dot(h2, w4, preferred_element_type=jnp.float32) + b4  # [BS, D]


# ----------------------------- wrapper --------------------------------------

_VMEM = pl.BlockSpec(memory_space=pltpu.MemorySpace.VMEM)


def pack_params(params):
    """One-time parameter packing (hoisted out of the per-call forward)."""
    wmv = jnp.concatenate([params["wm"], params["wv"]], axis=1)   # [H, 2Z]
    bmv = jnp.concatenate([params["bm"], params["bv"]], axis=1)   # [1, 2Z]
    slab_h = jnp.concatenate(
        [params["w1"], params["b1"], params["w3"], params["b3"]], axis=0)
    w2 = max(wmv.shape[1], params["w4"].shape[1])

    def pad_cols(a):
        return jnp.pad(a, ((0, 0), (0, w2 - a.shape[1])))

    slab_o = jnp.concatenate(
        [pad_cols(wmv), pad_cols(bmv), pad_cols(params["w4"]), pad_cols(params["b4"])],
        axis=0)
    return slab_h.astype(jnp.float32), slab_o.astype(jnp.float32)


@jax.jit
def autoencoder_forward(x, slab_h, slab_o, eps):
    """Mirrors AutoEncoder.forward: returns ((mu, logvar), output[B, S, D])."""
    B, D = x.shape
    _, S, Z = eps.shape
    eps_flat = eps.reshape(B * S, Z)   # batch-major, matches kernel layout

    dist_cat, logits = pl.pallas_call(
        vae_fused_kernel,
        out_shape=(
            jax.ShapeDtypeStruct((B, 2 * Z), jnp.float32),   # mu | logvar
            jax.ShapeDtypeStruct((B * S, D), jnp.float32),   # decoder logits
        ),
        in_specs=[_VMEM, _VMEM, _VMEM, _VMEM],
        out_specs=(_VMEM, _VMEM),
        compiler_params=pltpu.CompilerParams(vmem_limit_bytes=32 * 1024 * 1024),
    )(x, slab_h, slab_o, eps_flat)

    mu = dist_cat[:, :Z]
    logvar = dist_cat[:, Z:]
    output = logits.reshape(B, S, D)   # free host-side view
    return (mu, logvar), output


# ----------------------------- main ----------------------------------------

if __name__ == "__main__":
    B, D, H, Z, S = 2, 16, 32, 8, 4   # batch, data dim, hidden, latent, samples

    key = jax.random.PRNGKey(0)
    ks = jax.random.split(key, 10)

    def init(k, shape, scale):
        return scale * jax.random.normal(k, shape, jnp.float32)

    params = {
        "w1": init(ks[0], (D, H), 0.2), "b1": init(ks[1], (1, H), 0.05),
        "wm": init(ks[2], (H, Z), 0.2), "bm": init(ks[3], (1, Z), 0.05),
        "wv": init(ks[4], (H, Z), 0.2), "bv": init(ks[5], (1, Z), 0.05),
        "w3": init(ks[6], (Z, H), 0.2), "b3": init(ks[7], (1, H), 0.05),
        "w4": init(ks[8], (H, D), 0.2), "b4": jnp.zeros((1, D), jnp.float32),
    }

    # One-time packing (init-time), NOT per forward call.
    slab_h, slab_o = pack_params(params)
    jax.block_until_ready((slab_h, slab_o))

    x = jax.random.normal(ks[9], (B, D), jnp.float32)
    eps = jax.random.normal(jax.random.PRNGKey(42), (B, S, Z), jnp.float32)

    (mu, logvar), output = autoencoder_forward(x, slab_h, slab_o, eps)
    jax.block_until_ready((mu, logvar, output))

    # pure-JAX reference for sanity (f32 end to end; relax tolerances if the
    # bf16 matmul cast recommended for scaled v6e/v7x shapes is adopted).
    h = jnp.tanh(x @ params["w1"] + params["b1"])
    mu_ref = h @ params["wm"] + params["bm"]
    lv_ref = h @ params["wv"] + params["bv"]
    samp = mu_ref[:, None, :] + jnp.exp(0.5 * lv_ref)[:, None, :] * eps
    h2 = jnp.tanh(samp.reshape(B * S, Z) @ params["w3"] + params["b3"])
    out_ref = (h2 @ params["w4"] + params["b4"]).reshape(B, S, D)

    assert output.shape == (B, S, D)
    assert jnp.allclose(mu, mu_ref, atol=1e-5)
    assert jnp.allclose(logvar, lv_ref, atol=1e-5)
    assert jnp.allclose(output, out_ref, atol=1e-5)

    print("KERNEL_OK")
</pallas_src>

<mosaic_0001>
module attributes {stable_mosaic.version = 11 : i64} {
  func.func @vae_fused_kernel(%arg0: memref<2x16xf32, #tpu.memory_space<vmem>>, %arg1: memref<26x32xf32, #tpu.memory_space<vmem>>, %arg2: memref<66x16xf32, #tpu.memory_space<vmem>>, %arg3: memref<8x8xf32, #tpu.memory_space<vmem>>, %arg4: memref<2x16xf32, #tpu.memory_space<vmem>>, %arg5: memref<8x16xf32, #tpu.memory_space<vmem>>) attributes {dimension_semantics = [], scalar_prefetch = 0 : i64, scratch_operands = 0 : i64, tpu.core_type = #tpu.core_type<tc>} {
    %c0 = arith.constant 0 : index
    %c0_0 = arith.constant 0 : index
    %0 = vector.load %arg1[%c0, %c0_0] : memref<26x32xf32, #tpu.memory_space<vmem>>, vector<16x32xf32>
    %c16 = arith.constant 16 : index
    %c0_1 = arith.constant 0 : index
    %1 = vector.load %arg1[%c16, %c0_1] : memref<26x32xf32, #tpu.memory_space<vmem>>, vector<1x32xf32>
    %c17 = arith.constant 17 : index
    %c0_2 = arith.constant 0 : index
    %2 = vector.load %arg1[%c17, %c0_2] : memref<26x32xf32, #tpu.memory_space<vmem>>, vector<8x32xf32>
    %c25 = arith.constant 25 : index
    %c0_3 = arith.constant 0 : index
    %3 = vector.load %arg1[%c25, %c0_3] : memref<26x32xf32, #tpu.memory_space<vmem>>, vector<1x32xf32>
    %c0_4 = arith.constant 0 : index
    %c0_5 = arith.constant 0 : index
    %4 = vector.load %arg2[%c0_4, %c0_5] : memref<66x16xf32, #tpu.memory_space<vmem>>, vector<32x16xf32>
    %c32 = arith.constant 32 : index
    %c0_6 = arith.constant 0 : index
    %5 = vector.load %arg2[%c32, %c0_6] : memref<66x16xf32, #tpu.memory_space<vmem>>, vector<1x16xf32>
    %c33 = arith.constant 33 : index
    %c0_7 = arith.constant 0 : index
    %6 = vector.load %arg2[%c33, %c0_7] : memref<66x16xf32, #tpu.memory_space<vmem>>, vector<32x16xf32>
    %c65 = arith.constant 65 : index
    %c0_8 = arith.constant 0 : index
    %7 = vector.load %arg2[%c65, %c0_8] : memref<66x16xf32, #tpu.memory_space<vmem>>, vector<1x16xf32>
    %c0_9 = arith.constant 0 : index
    %c0_10 = arith.constant 0 : index
    %8 = vector.load %arg0[%c0_9, %c0_10] : memref<2x16xf32, #tpu.memory_space<vmem>>, vector<2x16xf32>
    %cst = arith.constant dense<0.000000e+00> : vector<2x32xf32>
    %9 = tpu.matmul %8, %0, %cst {dimension_numbers = #tpu.dot_dimension_numbers<[1], [0], [0], [1], [0, 0, 1, 1], [], []>} : vector<2x16xf32>, vector<16x32xf32>, vector<2x32xf32> -> vector<2x32xf32>
    %10 = vector.broadcast %1 : vector<1x32xf32> to vector<2x32xf32>
    %11 = arith.addf %9, %10 : vector<2x32xf32>
    %12 = math.tanh %11 : vector<2x32xf32>
    %cst_11 = arith.constant dense<0.000000e+00> : vector<2x16xf32>
    %13 = tpu.matmul %12, %4, %cst_11 {dimension_numbers = #tpu.dot_dimension_numbers<[1], [0], [0], [1], [0, 0, 1, 1], [], []>} : vector<2x32xf32>, vector<32x16xf32>, vector<2x16xf32> -> vector<2x16xf32>
    %14 = vector.broadcast %5 : vector<1x16xf32> to vector<2x16xf32>
    %15 = arith.addf %13, %14 : vector<2x16xf32>
    %c0_12 = arith.constant 0 : index
    %c0_13 = arith.constant 0 : index
    %16 = vector.load %arg4[%c0_12, %c0_13] : memref<2x16xf32, #tpu.memory_space<vmem>>, vector<2x16xf32>
    tpu.vector_store %arg4[%c0_12, %c0_13], %15 {strides = array<i32>} : memref<2x16xf32, #tpu.memory_space<vmem>>, vector<2x16xf32>,
    %17 = vector.extract_strided_slice %15 {offsets = [0, 0], sizes = [2, 8], strides = [1, 1]} : vector<2x16xf32> to vector<2x8xf32>
    %18 = vector.extract_strided_slice %15 {offsets = [0, 8], sizes = [2, 8], strides = [1, 1]} : vector<2x16xf32> to vector<2x8xf32>
    %cst_14 = arith.constant 5.000000e-01 : f32
    %19 = vector.broadcast %cst_14 : f32 to vector<2x8xf32>
    %20 = arith.mulf %19, %18 : vector<2x8xf32>
    %21 = math.exp %20 : vector<2x8xf32>
    %c0_15 = arith.constant 0 : index
    %c0_16 = arith.constant 0 : index
    %22 = vector.load %arg3[%c0_15, %c0_16] : memref<8x8xf32, #tpu.memory_space<vmem>>, vector<8x8xf32>
    %23 = vector.extract_strided_slice %17 {offsets = [0, 0], sizes = [1, 8], strides = [1, 1]} : vector<2x8xf32> to vector<1x8xf32>
    %24 = vector.extract_strided_slice %21 {offsets = [0, 0], sizes = [1, 8], strides = [1, 1]} : vector<2x8xf32> to vector<1x8xf32>
    %25 = vector.extract_strided_slice %22 {offsets = [0, 0], sizes = [4, 8], strides = [1, 1]} : vector<8x8xf32> to vector<4x8xf32>
    %26 = vector.broadcast %24 : vector<1x8xf32> to vector<4x8xf32>
    %27 = arith.mulf %26, %25 : vector<4x8xf32>
    %28 = vector.broadcast %23 : vector<1x8xf32> to vector<4x8xf32>
    %29 = arith.addf %28, %27 : vector<4x8xf32>
    %30 = vector.extract_strided_slice %17 {offsets = [1, 0], sizes = [1, 8], strides = [1, 1]} : vector<2x8xf32> to vector<1x8xf32>
    %31 = vector.extract_strided_slice %21 {offsets = [1, 0], sizes = [1, 8], strides = [1, 1]} : vector<2x8xf32> to vector<1x8xf32>
    %32 = vector.extract_strided_slice %22 {offsets = [4, 0], sizes = [4, 8], strides = [1, 1]} : vector<8x8xf32> to vector<4x8xf32>
    %33 = vector.broadcast %31 : vector<1x8xf32> to vector<4x8xf32>
    %34 = arith.mulf %33, %32 : vector<4x8xf32>
    %35 = vector.broadcast %30 : vector<1x8xf32> to vector<4x8xf32>
    %36 = arith.addf %35, %34 : vector<4x8xf32>
    %37 = tpu.concatenate %29, %36 in 0 : vector<4x8xf32>, vector<4x8xf32> -> vector<8x8xf32>
    %cst_17 = arith.constant dense<0.000000e+00> : vector<8x32xf32>
    %38 = tpu.matmul %37, %2, %cst_17 {dimension_numbers = #tpu.dot_dimension_numbers<[1], [0], [0], [1], [0, 0, 1, 1], [], []>} : vector<8x8xf32>, vector<8x32xf32>, vector<8x32xf32> -> vector<8x32xf32>
    %39 = vector.broadcast %3 : vector<1x32xf32> to vector<8x32xf32>
    %40 = arith.addf %38, %39 : vector<8x32xf32>
    %41 = math.tanh %40 : vector<8x32xf32>
    %cst_18 = arith.constant dense<0.000000e+00> : vector<8x16xf32>
    %42 = tpu.matmul %41, %6, %cst_18 {dimension_numbers = #tpu.dot_dimension_numbers<[1], [0], [0], [1], [0, 0, 1, 1], [], []>} : vector<8x32xf32>, vector<32x16xf32>, vector<8x16xf32> -> vector<8x16xf32>
    %43 = vector.broadcast %7 : vector<1x16xf32> to vector<8x16xf32>
    %44 = arith.addf %42, %43 : vector<8x16xf32>
    %c0_19 = arith.constant 0 : index
    %c0_20 = arith.constant 0 : index
    %45 = vector.load %arg5[%c0_19, %c0_20] : memref<8x16xf32, #tpu.memory_space<vmem>>, vector<8x16xf32>
    tpu.vector_store %arg5[%c0_19, %c0_20], %44 {strides = array<i32>} : memref<8x16xf32, #tpu.memory_space<vmem>>, vector<8x16xf32>,
    return
  }
}

</mosaic_0001>

<bundles_post_ra>
// kernel: autoencoder_forward.1
= control target key start
LH: loop header
LB: loop body
LE: loop exit
PB: predicated region body
PF: predicated region fallthrough
CT: control target
= control target key end

     0   :  { %v523_v2 = vmov 0.0|0.0   ;;  %vm524_vm0 = vmmov 0   ;;  %v525_v4 = vmov 0.0   ;;  %s643_s0 = inlined_call_operand.vmem [shape: f32[2,16], index: 0, kind: input, shape index: {}]   ;;  %s644_s1 = inlined_call_operand.vmem [shape: f32[26,32], index: 1, kind: input, shape index: {}]   ;;  %s645_s2 = inlined_call_operand.vmem [shape: f32[66,16], index: 2, kind: input, shape index: {}]   ;;  %s646_s3 = inlined_call_operand.vmem [shape: f32[8,8], index: 3, kind: input, shape index: {}]   ;;  %s647_s4 = inlined_call_operand.vmem [shape: f32[2,16], index: 4, kind: output, shape index: {0}]   ;;  %s648_s5 = inlined_call_operand.hbm [shape: f32[8,16], index: 5, kind: output, shape index: {1}]  }
   0x1   :  { %v20_v0 = vld [vmem:[%s644_s1] sm:$0xff]  ;;  %v21_v1 = vld [vmem:[%s644_s1 + $0x8] sm:$0xff]  ;;  %472 = vmatprep.subr.bf16.mxu1 %v523_v2  ;;  %442 = vmatprep.mubr.msk.f32.mxu1 %vm524_vm0, %v525_v4 }
   0x2   :  { %v473_v3 = vpack.c.bf16 %v21_v1, %v20_v0 }
   0x3   :  { %11 = vsyncpa [#allocation3], 0  ;;  %456 = vmatprep.subr.mxu0 %v525_v4  ;;  %458 = vmatprep.mubr.msk.f32.mxu0 %vm524_vm0, %v525_v4  ;;  %v35_v5 = vld [vmem:[%s643_s0] sm:$0x3]  ;;  %vm40_vm1 = vcmask 130048   ;;  %v26_v7 = vld [vmem:[%s645_s2 + $0x8] sm:$0xff]  ;;  %v199_v19 = vlaneseq }
   0x4   :  { %474 = vmatpush3.bf16.msra.mxu1 %v473_v3  ;;  %v25_v6 = vld [vmem:[%s645_s2] sm:$0xff]  ;;  %v27_v8 = vld [vmem:[%s645_s2 + $0x10] sm:$0xff]  ;;  %v28_v10 = vld [vmem:[%s645_s2 + $0x18] sm:$0xff]  ;;  %s526_s8 = smov 8   ;;  %vm119_vm2 = vcmask 261120   ;;  %vm193_vm3 = vcmask 123904  }
   0x5   :  { %475 = vmatprep.subr.bf16.mxu1 %v523_v2  ;;  %v476_v9 = vpack.c.bf16 %v26_v7, %v25_v6  ;;  %v479_v11 = vpack.c.bf16 %v28_v10, %v27_v8  ;;  %v198_v12 = vld [vmem:[%s646_s3] sm:$0xff]  ;;  %v415_v14 = vld [vmem:[%s644_s1 + $0x10] ss:$0 sm:$0xff]  ;;  %v200_v20 = vshrl.u32 %v199_v19, 7  ;;  %v23_v31 = vld [vmem:[%s644_s1 + $0x11] sm:$0xff]  ;;  %s527_s16 = smov 120  }
   0x6   :  { %v221_v13 = vrot.slane %v198_v12, 4  ;;  %v417_v21 = vld [vmem:[%s645_s2 + $0x20] ss:$0 sm:$0xff]  ;;  %457 = vmatpush3.msra.mxu0 %v23_v31  ;;  %vm238_vm4 = vcmask 1043456   ;;  %vm244_vm5 = vcmask 64512   ;;  %v30_v45 = vld [vmem:[%s645_s2 + $0x21] sm:$0xff] }
   0x7   :  { %443 = vmatmul.mubr.msk.f32.vlgmr.msra.gmra.mrb[0].mxu1 %vm40_vm1, %v35_v5  ;;  %v219_v22 = vsub.s32 1, %v200_v20  ;;  %v201_v23 = vsub.s32 0, %v200_v20  ;;  %481 = vmatprep.subr.bf16.mxu0 %v523_v2  ;;  %v31_v46 = vld [vmem:[%s645_s2 + $0x29] sm:$0xff]  ;;  %v32_v47 = vld [vmem:[%s645_s2 + $0x31] sm:$0xff]  ;;  %v33_v49 = vld [vmem:[%s645_s2 + $0x39] sm:$0xff]  ;;  %s528_s28 = smov [#allocation2]  }
   0x8   :  { %453 = vmatprep.mubr.msk.f32.mxu1 %vm524_vm0, %v525_v4  ;;  %477 = vmatpush3.bf16.msra.mxu1 %v476_v9  ;;  %v482_v48 = vpack.c.bf16 %v31_v46, %v30_v45  ;;  %v485_v50 = vpack.c.bf16 %v33_v49, %v32_v47  ;;  %v419_v51 = vld [vmem:[%s644_s1 + $0x19] ss:$0 sm:$0xff]  ;;  %v421_v56 = vld [vmem:[%s645_s2 + $0x41] ss:$0 sm:$0xff]  ;;  %s405_s29 = sshll.u32 %s528_s28, 4  ;;  %s406_s29 = int_to_ptr.vmem [resolvable:$true] %s405_s29 }
   0x9   :  { %478 = vmatprep.subr.bf16.mxu1 %v523_v2  ;;  %222 = vrot.lane.b32.xlu0 %v221_v13, %s526_s8  ;;  %s499_s1 = scalar_lea.vmem %s406_s29, 128  ;;  %p504_p1 = scmp.lt.s32.totalorder %s406_s29, %s406_s29 }
   0xa   :  { %p500_p0 = scmp.ne.s32.totalorder %s406_s29, %s499_s1  ;;  %p505_p2 = scmp.lt.s32.totalorder %s499_s1, %s499_s1 }
   0xc   :  { %480 = vmatpush3.bf16.msra.mxu1 %v479_v11  ;;  %p506_p3 = por %p505_p2, %p504_p1 }
   0xd   :  { %204 = vrot.lane.b32.xlu0 %v198_v12, %s526_s8 }
   0xe   :  { %p507_p4 = pnand %p506_p3, %p500_p0 }
  0x7b   :  { %v223_v32 = vpop.permute.xlu0 %222 }
  0x7f   :  { %v205_v37 = vpop.permute.xlu0 %204 }
  0xda   :  { %v110_v15 = vpop.f32.mrb[0].mxu1 }
  0xdb   :  { %v111_v16 = vadd.f32 %v415_v14, %v110_v15  ;;  %v444_v17 = vpop.f32.mrb[1].mxu1 }
  0xdd   :  { %493 = vtanh.f32 %v111_v16 }
  0xe7   :  { %v494_v18 = vpop.eup %493 }
  0xe8   :  { %454 = vmatmul.mubr.msk.f32.vlgmr.msra.gmra.mrb[2].mxu1 %vm119_vm2, %v494_v18 }
 0x1bb   :  { %v189_v24 = vpop.f32.mrb[2].mxu1 }
 0x1bc   :  { %v190_v25 = vadd.f32 %v417_v21, %v189_v24  ;;  %v455_v26 = vpop.f32.mrb[3].mxu1 }
 0x1be   :  { %194 = vst.msk [vmem:[%s647_s4] sm:$0x3] %vm193_vm3, %v190_v25  ;;  %v195_v27 = vmul.f32 0.5, %v190_v25  ;;  %v229_v28 = vrot.slane %v190_v25, %v219_v22  ;;  %v211_v29 = vrot.slane %v190_v25, %v201_v23 }
 0x1c0   :  { %v196_v30 = vmul.f32 1.442695, %v195_v27 }
 0x1c2   :  { %495 = vpow2.f32 %v196_v30 }
 0x1cc   :  { %v496_v33 = vpop.eup %495 }
 0x1cd   :  { %v220_v34 = vrot.slane %v496_v33, %v219_v22  ;;  %v202_v36 = vrot.slane %v496_v33, %v201_v23 }
 0x1cf   :  { %v225_v35 = vmul.f32 %v223_v32, %v220_v34  ;;  %v207_v38 = vmul.f32 %v205_v37, %v202_v36 }
 0x1d1   :  { %231 = vrot.lane.b32.xlu1 %v225_v35, %s527_s16 }
 0x1d5   :  { %213 = vrot.lane.b32.xlu1 %v207_v38, %s527_s16 }
 0x243   :  { %v232_v39 = vpop.permute.xlu1 %231 }
 0x244   :  { %v234_v40 = vadd.f32 %v232_v39, %v229_v28 }
 0x246   :  { %v236_v42 = vrot.slane %v234_v40, 4 }
 0x247   :  { %v214_v41 = vpop.permute.xlu1 %213 }
 0x248   :  { %v216_v43 = vadd.f32 %v214_v41, %v211_v29 }
 0x24a   :  { %v239_v44 = vsel %vm238_vm4, %v216_v43, %v236_v42 }
 0x24b   :  { %459 = vmatmul.mubr.msk.f32.vlgmr.msra.gmra.mrb[0].mxu0 %vm244_vm5, %v239_v44 }
 0x24c   :  { %469 = vmatprep.mubr.msk.f32.mxu0 %vm524_vm0, %v525_v4  ;;  %483 = vmatpush3.bf16.msra.mxu0 %v482_v48 }
 0x24d   :  { %484 = vmatprep.subr.bf16.mxu0 %v523_v2 }
 0x250   :  { %486 = vmatpush3.bf16.msra.mxu0 %v485_v50 }
 0x31e   :  { %v314_v52 = vpop.f32.mrb[0].mxu0 }
 0x31f   :  { %v315_v53 = vadd.f32 %v419_v51, %v314_v52  ;;  %v460_v54 = vpop.f32.mrb[1].mxu0 }
 0x321   :  { %497 = vtanh.f32 %v315_v53 }
 0x32b   :  { %v498_v55 = vpop.eup %497 }
 0x32c   :  { %470 = vmatmul.mubr.msk.f32.vlgmr.msra.gmra.mrb[2].mxu0 %vm119_vm2, %v498_v55 }
 0x3ff   :  { %v392_v57 = vpop.f32.mrb[2].mxu0 }
 0x400   :  { %v393_v58 = vadd.f32 %v421_v56, %v392_v57  ;;  %v471_v59 = vpop.f32.mrb[3].mxu0 }
 0x402   :  { %396 = vst.msk [vmem:[#allocation2] sm:$0xff] %vm40_vm1, %v393_v58 }
 0x403   :  { %510 = shalt.err (!%p507_p4)
}
 0x404   :  { %s511_s6 = scalar_lea.hbm %s648_s5, 128 }
 0x405   :  { %p512_p5 = scmp.ne.s32.totalorder %s648_s5, %s511_s6  ;;  %p515_p6 = scmp.lt.u32.totalorder %s511_s6, %s648_s5 }
 0x407   :  { %p517_p7 = pnand %p515_p6, %p512_p5 }
 0x409   :  { %520 = shalt.err (!%p517_p7)
}
 0x40a   :  { %408 = dma.vmem_to_hbm [thread:$0]  %s406_s29, 128, %s648_s5, [#allocation3]  }
 0x40b   :  { %521 = dma.done.wait [#allocation3], 128  }
 0x40c   :  { %522 = vsyncadd [#allocation3], 4294967168 }
 0x40d   :  { %414 = vsyncpa [#allocation3], 1 }

</bundles_post_ra>
